<compile_context>
chip_gen: v5e
topology: v5e:2x2
jax: 0.10.0
libtpu: 0.0.40
codegen_flags: <defaults>
</compile_context>

<pallas_src>
import functools

import jax
import jax.numpy as jnp
from jax.experimental import pallas as pl
from jax.experimental.pallas import tpu as pltpu

_LANE = 128          # vreg lane width (batch lives on lanes)
_SUBLANE = 8         # f32 sublane count
_TILE_B = 2048       # batch-lane tile for the gridded (large-batch) path
_NO_GRID_MAX_B = 2048  # single-invocation (no-grid) path up to this padded batch


def _round_up(n, m):
    return ((n + m - 1) // m) * m


def _qnet_kernel(x_ref, w1_ref, b1_ref, w2_ref, b2_ref, o_ref):
    """Fused Linear -> ReLU -> Linear, transposed (batch on lanes).

    Per grid step:
      x_ref : (Kp, Bt)  compute dtype (bf16 by default)
      w1_ref: (Hp, Kp)  compute dtype (pre-padded, pre-cast)
      b1_ref: (Hp, 1)   f32
      w2_ref: (Np, Hp)  compute dtype
      b2_ref: (Np, 1)   f32
      o_ref : (Np, Bt)  f32
    """
    # Hidden layer: h = relu(W1 @ xT + b1). MXU matmul, f32 accumulate/epilogue.
    h = jnp.dot(w1_ref[...], x_ref[...], preferred_element_type=jnp.float32)
    h = jnp.maximum(h + b1_ref[...], 0.0)          # (Hp,1) bias lane-broadcast
    # Output layer: y = W2 @ h + b2.
    y = jnp.dot(w2_ref[...], h.astype(w2_ref.dtype),
                preferred_element_type=jnp.float32)
    o_ref[...] = (y + b2_ref[...]).astype(o_ref.dtype)


def prepare_params(w1, b1, w2, b2, compute_dtype=jnp.bfloat16):
    """Pad + pre-cast nn.Linear-layout parameters ONCE (outside the step loop).

    Args:
      w1: (hidden, in)   b1: (hidden,)   w2: (out, hidden)   b2: (out,)
      compute_dtype: matmul operand dtype (bf16 default; use f32 if DQN
        training stability requires exact nn.Linear numerics).
    Returns:
      dict of padded device arrays + static sizes.
    """
    H, K = w1.shape
    N = w2.shape[0]
    Kp = _round_up(max(K, 16), 16)           # bf16 sublane-pair friendly
    Hp = _round_up(max(H, 16), 16)
    Np = _round_up(max(N, _SUBLANE), _SUBLANE)

    # Zero padding keeps semantics exact: extra hidden rows give relu(0)=0 and
    # multiply zero W2 columns; extra output rows are sliced off after the call.
    w1p = jnp.zeros((Hp, Kp), compute_dtype).at[:H, :K].set(w1.astype(compute_dtype))
    b1p = jnp.zeros((Hp, 1), jnp.float32).at[:H, 0].set(b1.astype(jnp.float32))
    w2p = jnp.zeros((Np, Hp), compute_dtype).at[:N, :H].set(w2.astype(compute_dtype))
    b2p = jnp.zeros((Np, 1), jnp.float32).at[:N, 0].set(b2.astype(jnp.float32))
    return dict(w1p=w1p, b1p=b1p, w2p=w2p, b2p=b2p,
                input_size=K, hidden_size=H, output_size=N)


def linear_qnet_forward(x, w1p, b1p, w2p, b2p, *, output_size):
    """Forward pass. x: (B, input_size) or (input_size,). Returns (B, output_size)."""
    squeeze = (x.ndim == 1)
    if squeeze:
        x = x[None, :]
    B, K = x.shape
    Hp, Kp = w1p.shape
    Np, Hp2 = w2p.shape
    assert Hp2 == Hp and K <= Kp and output_size <= Np
    cdtype = w1p.dtype

    # Batch padded only to a lane multiple (128) -- never to a full tile.
    Bp = _round_up(max(B, _LANE), _LANE)
    # Transpose + pad + cast x in one fused XLA op: (B, K) -> (Kp, Bp), batch on lanes.
    xT = jnp.zeros((Kp, Bp), cdtype).at[:K, :B].set(x.T.astype(cdtype))

    out_shape = jax.ShapeDtypeStruct((Np, Bp), jnp.float32)

    if Bp <= _NO_GRID_MAX_B:
        # Small/medium batch: single no-grid invocation, whole arrays in VMEM,
        # no pipeline machinery.
        out = pl.pallas_call(
            _qnet_kernel,
            out_shape=out_shape,
            in_specs=[pl.BlockSpec(memory_space=pltpu.MemorySpace.VMEM)] * 5,
            out_specs=pl.BlockSpec(memory_space=pltpu.MemorySpace.VMEM),
        )(xT, w1p, b1p, w2p, b2p)
    else:
        # Large batch: tile only the batch-lane axis with pl.cdiv (partial tail
        # block is masked by Pallas -- no zero-tile round-up). Weights/biases keep
        # a constant block index so they stay VMEM-resident across the grid.
        # Grid is always >= 2 here (Bp > _TILE_B), so the "parallel" axis can
        # shard across v7x's two TensorCores.
        out = pl.pallas_call(
            _qnet_kernel,
            out_shape=out_shape,
            grid=(pl.cdiv(Bp, _TILE_B),),
            in_specs=[
                pl.BlockSpec((Kp, _TILE_B), lambda i: (0, i)),
                pl.BlockSpec((Hp, Kp), lambda i: (0, 0)),
                pl.BlockSpec((Hp, 1), lambda i: (0, 0)),
                pl.BlockSpec((Np, Hp), lambda i: (0, 0)),
                pl.BlockSpec((Np, 1), lambda i: (0, 0)),
            ],
            out_specs=pl.BlockSpec((Np, _TILE_B), lambda i: (0, i)),
            compiler_params=pltpu.CompilerParams(
                dimension_semantics=("parallel",)),
        )(xT, w1p, b1p, w2p, b2p)

    y = out[:output_size, :B].T
    return y[0] if squeeze else y


def init_params(key, input_size, hidden_size, output_size):
    """nn.Linear default init U(-1/sqrt(fan_in), 1/sqrt(fan_in)), PyTorch layout."""
    k1, k2, k3, k4 = jax.random.split(key, 4)
    bound1 = float(1.0 / (input_size ** 0.5))
    bound2 = float(1.0 / (hidden_size ** 0.5))
    w1 = jax.random.uniform(k1, (hidden_size, input_size), jnp.float32, -bound1, bound1)
    b1 = jax.random.uniform(k2, (hidden_size,), jnp.float32, -bound1, bound1)
    w2 = jax.random.uniform(k3, (output_size, hidden_size), jnp.float32, -bound2, bound2)
    b2 = jax.random.uniform(k4, (output_size,), jnp.float32, -bound2, bound2)
    return w1, b1, w2, b2


def _ref_forward_f32(x, w1, b1, w2, b2):
    h = jnp.maximum(x @ w1.T + b1, 0.0)
    return h @ w2.T + b2


def _ref_forward_bf16(x, w1, b1, w2, b2):
    bf = jnp.bfloat16
    h = jnp.dot(x.astype(bf), w1.T.astype(bf), preferred_element_type=jnp.float32) + b1
    h = jnp.maximum(h, 0.0)
    return jnp.dot(h.astype(bf), w2.T.astype(bf), preferred_element_type=jnp.float32) + b2


if __name__ == "__main__":
    # Shapes consistent with a typical snake-game Q-net, kept small.
    batch = 8
    input_size = 11
    hidden_size = 32
    output_size = 3

    key = jax.random.PRNGKey(0)
    kx, kp, kb, km = jax.random.split(key, 4)
    x = jax.random.normal(kx, (batch, input_size), dtype=jnp.float32)
    w1, b1, w2, b2 = init_params(kp, input_size, hidden_size, output_size)

    # Pad/cast the parameters ONCE; reuse on every forward call.
    params = prepare_params(w1, b1, w2, b2)

    fwd = jax.jit(functools.partial(linear_qnet_forward, output_size=output_size))
    args = (params["w1p"], params["b1p"], params["w2p"], params["b2p"])

    # --- small batch (no-grid path) ---
    out = jax.block_until_ready(fwd(x, *args))
    assert out.shape == (batch, output_size)
    assert jnp.allclose(out, _ref_forward_bf16(x, w1, b1, w2, b2), atol=1e-3, rtol=1e-3)
    assert jnp.allclose(out, _ref_forward_f32(x, w1, b1, w2, b2), atol=1e-1, rtol=1e-1)

    # --- single unbatched state (1-D input, as used during play) ---
    out1 = jax.block_until_ready(fwd(x[0], *args))
    assert out1.shape == (output_size,)
    assert jnp.allclose(out1, out[0], atol=1e-5, rtol=1e-5)

    # --- mid-size replay-buffer batch (still no-grid: B=1000 -> Bp=1024) ---
    xm = jax.random.normal(km, (1000, input_size), dtype=jnp.float32)
    outm = jax.block_until_ready(fwd(xm, *args))
    assert outm.shape == (1000, output_size)
    assert jnp.allclose(outm, _ref_forward_bf16(xm, w1, b1, w2, b2), atol=1e-3, rtol=1e-3)

    # --- large batch (gridded path, partial tail block, no tile round-up) ---
    big_batch = 4096 + 37
    xb = jax.random.normal(kb, (big_batch, input_size), dtype=jnp.float32)
    outb = jax.block_until_ready(fwd(xb, *args))
    assert outb.shape == (big_batch, output_size)
    assert jnp.allclose(outb, _ref_forward_bf16(xb, w1, b1, w2, b2), atol=1e-3, rtol=1e-3)
    assert jnp.allclose(outb, _ref_forward_f32(xb, w1, b1, w2, b2), atol=1e-1, rtol=1e-1)

    print("KERNEL_OK")
</pallas_src>

<mosaic_0001>
module attributes {stable_mosaic.version = 11 : i64} {
  func.func @_qnet_kernel(%arg0: memref<16x128xbf16, #tpu.memory_space<vmem>>, %arg1: memref<32x16xbf16, #tpu.memory_space<vmem>>, %arg2: memref<32x1xf32, #tpu.memory_space<vmem>>, %arg3: memref<8x32xbf16, #tpu.memory_space<vmem>>, %arg4: memref<8x1xf32, #tpu.memory_space<vmem>>, %arg5: memref<8x128xf32, #tpu.memory_space<vmem>>) attributes {dimension_semantics = [], scalar_prefetch = 0 : i64, scratch_operands = 0 : i64, tpu.core_type = #tpu.core_type<tc>} {
    %c0 = arith.constant 0 : index
    %c0_0 = arith.constant 0 : index
    %0 = vector.load %arg1[%c0, %c0_0] : memref<32x16xbf16, #tpu.memory_space<vmem>>, vector<32x16xbf16>
    %c0_1 = arith.constant 0 : index
    %c0_2 = arith.constant 0 : index
    %1 = vector.load %arg0[%c0_1, %c0_2] : memref<16x128xbf16, #tpu.memory_space<vmem>>, vector<16x128xbf16>
    %cst = arith.constant dense<0.000000e+00> : vector<32x128xf32>
    %2 = tpu.matmul %0, %1, %cst {dimension_numbers = #tpu.dot_dimension_numbers<[1], [0], [0], [1], [0, 0, 1, 1], [], []>} : vector<32x16xbf16>, vector<16x128xbf16>, vector<32x128xf32> -> vector<32x128xf32>
    %c0_3 = arith.constant 0 : index
    %c0_4 = arith.constant 0 : index
    %3 = vector.load %arg2[%c0_3, %c0_4] : memref<32x1xf32, #tpu.memory_space<vmem>>, vector<32x1xf32>
    %4 = vector.broadcast %3 : vector<32x1xf32> to vector<32x128xf32>
    %5 = arith.addf %2, %4 : vector<32x128xf32>
    %cst_5 = arith.constant 0.000000e+00 : f32
    %6 = vector.broadcast %cst_5 : f32 to vector<32x128xf32>
    %7 = arith.maximumf %5, %6 : vector<32x128xf32>
    %c0_6 = arith.constant 0 : index
    %c0_7 = arith.constant 0 : index
    %8 = vector.load %arg3[%c0_6, %c0_7] : memref<8x32xbf16, #tpu.memory_space<vmem>>, vector<8x32xbf16>
    %9 = arith.truncf %7 : vector<32x128xf32> to vector<32x128xbf16>
    %cst_8 = arith.constant dense<0.000000e+00> : vector<8x128xf32>
    %10 = tpu.matmul %8, %9, %cst_8 {dimension_numbers = #tpu.dot_dimension_numbers<[1], [0], [0], [1], [0, 0, 1, 1], [], []>} : vector<8x32xbf16>, vector<32x128xbf16>, vector<8x128xf32> -> vector<8x128xf32>
    %c0_9 = arith.constant 0 : index
    %c0_10 = arith.constant 0 : index
    %11 = vector.load %arg4[%c0_9, %c0_10] : memref<8x1xf32, #tpu.memory_space<vmem>>, vector<8x1xf32>
    %12 = vector.broadcast %11 : vector<8x1xf32> to vector<8x128xf32>
    %13 = arith.addf %10, %12 : vector<8x128xf32>
    %c0_11 = arith.constant 0 : index
    %c0_12 = arith.constant 0 : index
    %14 = vector.load %arg5[%c0_11, %c0_12] : memref<8x128xf32, #tpu.memory_space<vmem>>, vector<8x128xf32>
    tpu.vector_store %arg5[%c0_11, %c0_12], %13 {strides = array<i32>} : memref<8x128xf32, #tpu.memory_space<vmem>>, vector<8x128xf32>,
    return
  }
}

</mosaic_0001>

<bundles_post_ra>
// kernel: linear_qnet_forward.1
= control target key start
LH: loop header
LB: loop body
LE: loop exit
PB: predicated region body
PF: predicated region fallthrough
CT: control target
= control target key end

     0   :  { %v151_v2 = vmov 0   ;;  %vm67_vm0 = vcmask 130048   ;;  %vm106_vm1 = vcmask 261120   ;;  %s212_s0 = inlined_call_operand.vmem [shape: bf16[16,128], index: 0, kind: input, shape index: {}]   ;;  %s213_s1 = inlined_call_operand.vmem [shape: bf16[32,16], index: 1, kind: input, shape index: {}]   ;;  %s214_s2 = inlined_call_operand.vmem [shape: f32[32,1], index: 2, kind: input, shape index: {}]   ;;  %s215_s4 = inlined_call_operand.vmem [shape: f32[8,1], index: 4, kind: input, shape index: {}]   ;;  %s216_s3 = inlined_call_operand.vmem [shape: bf16[8,32], index: 3, kind: input, shape index: {}]   ;;  %s217_s5 = inlined_call_operand.vmem [shape: f32[8,128], index: 5, kind: output, shape index: {}]  }
   0x1   :  { %v145_v0 = vld [vmem:[%s212_s0] sm:$0xff]  ;;  %v144_v1 = vld [vmem:[%s213_s1 + $0x8] sm:$0xff]  ;;  %148 = vset.pattern.permute.xlu0 %v151_v2  ;;  %149 = vset.pattern.permute.xlu1 %v151_v2  ;;  %v29_v4 = vld [vmem:[%s214_s2 + $0x10] sm:$0xff] }
   0x2   :  { %v143_v3 = vld [vmem:[%s213_s1] sm:$0xff]  ;;  %150 = vset.pattern.permute.xlu2 %v151_v2  ;;  %146 = vmatpush.bf16.msra.mxu2 %v145_v0  ;;  %v30_v6 = vld [vmem:[%s214_s2 + $0x18] sm:$0xff]  ;;  %v28_v7 = vld [vmem:[%s214_s2 + $0x8] sm:$0xff] }
   0x3   :  { %v27_v5 = vld [vmem:[%s214_s2] sm:$0xff]  ;;  %81 = vmatpush.bf16.msra.mxu0 %v145_v0  ;;  %43 = vperm.xlu0 %148, %v29_v4  }
   0x4   :  { %33 = vperm.xlu1 %149, %v27_v5   ;;  %v100_v8 = vld [vmem:[%s215_s4] sm:$0xff] }
   0x5   :  { %141 = vmatmul.msk.bf16.vlgmr.msra.gmra.mxu2 %vm67_vm0, %v144_v1  ;;  %103 = vperm.xlu2 %150, %v100_v8   ;;  %v97_v27 = vld [vmem:[%s216_s3] sm:$0xf] }
   0x6   :  { %140 = vmatmul.msk.bf16.vlgmr.msra.gmra.mxu0 %vm67_vm0, %v143_v3 }
   0xb   :  { %48 = vperm.xlu0 %148, %v30_v6  }
   0xc   :  { %38 = vperm.xlu1 %149, %v28_v7  }
  0x5f   :  { %v104_v28 = vpop.permute.xlu2 %103 }
  0x75   :  { %v44_v11 = vpop.permute.xlu0 %43 }
  0x76   :  { %v34_v9 = vpop.permute.xlu1 %33 }
  0x7d   :  { %v49_v16 = vpop.permute.xlu0 %48 }
  0x7e   :  { %v39_v13 = vpop.permute.xlu1 %38 }
  0x83   :  { %v83_v10 = vpop.f32.mrf.mxu0 }
  0x84   :  { %v84_v18 = vadd.f32 %v83_v10, %v34_v9 }
  0x86   :  { %v93_v23 = vmax.f32 %v84_v18, 0.0 }
  0x88   :  { %v88_v12 = vpop.f32.mrf.mxu2 }
  0x89   :  { %v89_v15 = vadd.f32 %v88_v12, %v44_v11 }
  0x8b   :  { %v85_v14 = vpop.f32.mrf.mxu0  ;;  %v95_v21 = vmax.f32 %v89_v15, 0.0 }
  0x8c   :  { %v86_v19 = vadd.f32 %v85_v14, %v39_v13 }
  0x8e   :  { %v94_v24 = vmax.f32 %v86_v19, 0.0 }
  0x90   :  { %v90_v17 = vpop.f32.mrf.mxu2  ;;  %v98_v26 = vpack.c.bf16 %v94_v24, %v93_v23 }
  0x91   :  { %v91_v20 = vadd.f32 %v90_v17, %v49_v16 }
  0x93   :  { %v96_v22 = vmax.f32 %v91_v20, 0.0 }
  0x95   :  { %v99_v25 = vpack.c.bf16 %v96_v22, %v95_v21 }
  0x97   :  { %116 = vmatpush.bf16.msra.mxu1 %v99_v25 }
  0x9b   :  { %117 = vmatpush.bf16.msra.mxu1 %v98_v26 }
  0x9e   :  { %142 = vmatmul.msk.bf16.vlgmr.msra.gmra.mxu1 %vm106_vm1, %v97_v27 }
 0x11b   :  { %v119_v29 = vpop.f32.mrf.mxu1 }
 0x11c   :  { %v120_v30 = vadd.f32 %v119_v29, %v104_v28 }
 0x11e   :  { %123 = vst [vmem:[%s217_s5] sm:$0xff] %v120_v30 }
 0x123   :  { %v121_v31 = vpop.f32.mrf.mxu1 }

</bundles_post_ra>
